<compile_context>
chip_gen: v6e
topology: v6e:2x2x1
jax: 0.10.0
libtpu: 0.0.40
codegen_flags: <defaults>
</compile_context>

<pallas_src>
import functools

import jax
import jax.numpy as jnp
from jax import lax
from jax.experimental import pallas as pl
from jax.experimental.pallas import tpu as pltpu

_OUT_SUB = 8      # output row padded to one full (8, 128) f32 tile -> unmasked vst
_OUT_LANE = 128


def _loss_scl_v_kernel(sn_ref, sa_ref, yn_ref, ya_ref, fn_ref, fa_ref, out_ref,
                       *, alpha_over_b, inv_n_scores, margin, batch_total):
    i = pl.program_id(0)
    tb, T, D = fn_ref.shape

    # ---- feature-magnitude term: ||mean_T(feat)||_2 per batch row -------------
    def seg_norm(f_ref):
        # T is on the sublane axis -> f_ref[:, t, :] is an aligned sublane slice
        # (no lane rotates / masked extracts).  Cast per-slice so peak f32
        # footprint is ~2 (tb, D) slabs, not the whole (tb, T, D) tile.
        # (With D >= 128 / very large T an MXU ones-matmul would be the
        #  alternative; not worth it at these D.)
        acc0 = f_ref[:, 0, :].astype(jnp.float32)
        if T > 1:
            acc1 = f_ref[:, 1, :].astype(jnp.float32)
        else:
            acc1 = jnp.zeros_like(acc0)
        for t in range(2, T, 2):
            acc0 = acc0 + f_ref[:, t, :].astype(jnp.float32)
        for t in range(3, T, 2):
            acc1 = acc1 + f_ref[:, t, :].astype(jnp.float32)
        mean = (acc0 + acc1) * (1.0 / T)                                # (tb, D)
        return jnp.sqrt(jnp.sum(mean * mean, axis=1, keepdims=True))   # (tb, 1)

    norm_n = seg_norm(fn_ref)
    norm_a = seg_norm(fa_ref)
    loss_a_nor = jnp.abs(jnp.float32(margin) - norm_a) + norm_n        # (tb, 1)

    # Mask padded rows of a partial last tile (garbage beyond B must not count).
    row = lax.broadcasted_iota(jnp.int32, (tb, 1), 0) + i * tb
    loss_a_nor = jnp.where(row < batch_total, loss_a_nor, 0.0)

    contrib = jnp.sum(loss_a_nor * loss_a_nor, axis=0, keepdims=True)  # (1, 1)
    contrib = contrib * jnp.float32(alpha_over_b)                      # alpha * sum / B

    # Lane-dense, unmasked store of this tile's partial (value replicated).
    out_ref[...] = jnp.broadcast_to(contrib, (1, _OUT_SUB, _OUT_LANE))

    # ---- BCE classification term, computed exactly once (tile 0 only) --------
    @pl.when(i == 0)
    def _():
        def bce_sum(s_ref, y_ref):
            s = s_ref[...].astype(jnp.float32)        # (1, B) lane-major
            y = y_ref[...].astype(jnp.float32)
            # PyTorch BCELoss clamps log outputs at -100.  Keep the general
            # two-log form so soft labels stay exact.
            log_s = jnp.maximum(jnp.log(s), -100.0)
            log_1ms = jnp.maximum(jnp.log(1.0 - s), -100.0)
            return jnp.sum(-(y * log_s + (1.0 - y) * log_1ms),
                           axis=1, keepdims=True)     # (1, 1)

        loss_cls = (bce_sum(sn_ref, yn_ref) + bce_sum(sa_ref, ya_ref))
        loss_cls = loss_cls * jnp.float32(inv_n_scores)
        out_ref[...] = out_ref[...] + jnp.broadcast_to(
            loss_cls, (1, _OUT_SUB, _OUT_LANE))


def loss_scl_v(score_normal, score_abnormal, nlabel, alabel, feat_n, feat_a,
               *, alpha, margin,
               vmem_budget_bytes=40 * 1024 * 1024,
               vmem_limit_bytes=48 * 1024 * 1024):
    """JAX/Pallas equivalent of loss_SCL_V.forward (returns a scalar)."""
    # Lane-major (1, B) views; native dtypes (no wrapper-side up-casts).
    sn = score_normal.reshape(1, -1)
    sa = score_abnormal.reshape(1, -1)
    yn = nlabel.reshape(1, -1)
    ya = alabel.reshape(1, -1)

    B, T, D = feat_n.shape
    assert feat_a.shape == (B, T, D)

    # Biggest batch tile whose double-buffered feature DMA working set
    # (2 tensors x 2 pipeline buffers x tb x T x D x itemsize) fits the VMEM
    # budget.  Budget is conservative for v7x (64 MiB physical); on v5e/v6e
    # (128 MiB) both budget and limit can be raised for slightly better HBM
    # roofline utilisation.
    itemsize = jnp.dtype(feat_n.dtype).itemsize
    row_bytes = max(1, T * D * itemsize)
    tb = max(1, vmem_budget_bytes // (2 * 2 * row_bytes))
    if tb >= 8:
        tb = (tb // 8) * 8
    tb = int(min(tb, B))
    num_tiles = int(pl.cdiv(B, tb))

    kernel = functools.partial(
        _loss_scl_v_kernel,
        alpha_over_b=float(alpha) / float(B),
        inv_n_scores=1.0 / float(sn.shape[1] + sa.shape[1]),
        margin=float(margin),
        batch_total=int(B),
    )

    grid_spec = pltpu.PrefetchScalarGridSpec(
        num_scalar_prefetch=0,
        grid=(num_tiles,),
        in_specs=[
            pl.BlockSpec(sn.shape, lambda i: (0, 0)),        # score_normal
            pl.BlockSpec(sa.shape, lambda i: (0, 0)),        # score_abnormal
            pl.BlockSpec(yn.shape, lambda i: (0, 0)),        # nlabel
            pl.BlockSpec(ya.shape, lambda i: (0, 0)),        # alabel
            pl.BlockSpec((tb, T, D), lambda i: (i, 0, 0)),   # feat_n (native dtype)
            pl.BlockSpec((tb, T, D), lambda i: (i, 0, 0)),   # feat_a (native dtype)
        ],
        out_specs=pl.BlockSpec((1, _OUT_SUB, _OUT_LANE), lambda i: (i, 0, 0)),
    )

    partials = pl.pallas_call(
        kernel,
        out_shape=jax.ShapeDtypeStruct((num_tiles, _OUT_SUB, _OUT_LANE),
                                       jnp.float32),
        grid_spec=grid_spec,
        compiler_params=pltpu.CompilerParams(
            dimension_semantics=("parallel",),       # both TCs on megacore parts
            vmem_limit_bytes=int(vmem_limit_bytes),
        ),
    )(sn, sa, yn, ya, feat_n, feat_a)

    # Trivial final reduction over num_tiles per-tile partials.
    return jnp.sum(partials[:, 0, 0])


def _reference(score_normal, score_abnormal, nlabel, alabel, feat_n, feat_a,
               *, alpha, margin):
    score = jnp.concatenate([score_normal.reshape(-1),
                             score_abnormal.reshape(-1)], 0).astype(jnp.float32)
    label = jnp.concatenate([nlabel.reshape(-1),
                             alabel.reshape(-1)], 0).astype(jnp.float32)
    log_s = jnp.maximum(jnp.log(score), -100.0)
    log_1ms = jnp.maximum(jnp.log(1.0 - score), -100.0)
    loss_cls = jnp.mean(-(label * log_s + (1.0 - label) * log_1ms))
    fn = feat_n.astype(jnp.float32)
    fa = feat_a.astype(jnp.float32)
    norm_a = jnp.linalg.norm(jnp.mean(fa, axis=1), axis=1)
    norm_n = jnp.linalg.norm(jnp.mean(fn, axis=1), axis=1)
    loss_a_nor = jnp.abs(margin - norm_a) + norm_n
    loss_v = jnp.mean(loss_a_nor ** 2)
    return loss_cls + alpha * loss_v


if __name__ == "__main__":
    key = jax.random.PRNGKey(0)
    B, T, D = 2, 8, 32          # batch-per-class, temporal segments, feature dim
    alpha, margin = 0.0001, 100.0

    k1, k2, k3, k4 = jax.random.split(key, 4)
    # Scores are sigmoid outputs in (0, 1), shaped (B, 1) like the torch module.
    score_normal = jax.nn.sigmoid(jax.random.normal(k1, (B, 1), jnp.float32))
    score_abnormal = jax.nn.sigmoid(jax.random.normal(k2, (B, 1), jnp.float32))
    nlabel = jnp.zeros((B,), jnp.float32)
    alabel = jnp.ones((B,), jnp.float32)
    # Features in native bf16 (no wrapper up-cast; per-slice cast in the kernel).
    feat_n = jax.random.normal(k3, (B, T, D), jnp.float32).astype(jnp.bfloat16)
    feat_a = jax.random.normal(k4, (B, T, D), jnp.float32).astype(jnp.bfloat16)

    out = loss_scl_v(score_normal, score_abnormal, nlabel, alabel,
                     feat_n, feat_a, alpha=alpha, margin=margin)
    out = jax.block_until_ready(out)

    ref = _reference(score_normal, score_abnormal, nlabel, alabel,
                     feat_n, feat_a, alpha=alpha, margin=margin)
    assert jnp.allclose(out, ref, rtol=1e-5, atol=1e-5), (out, ref)

    print("KERNEL_OK")
</pallas_src>

<mosaic_0001>
module attributes {stable_mosaic.version = 11 : i64} {
  func.func @_loss_scl_v_kernel(%arg0: i32, %arg1: memref<1x2xf32, #tpu.memory_space<vmem>>, %arg2: memref<1x2xf32, #tpu.memory_space<vmem>>, %arg3: memref<1x2xf32, #tpu.memory_space<vmem>>, %arg4: memref<1x2xf32, #tpu.memory_space<vmem>>, %arg5: memref<2x8x32xbf16, #tpu.memory_space<vmem>>, %arg6: memref<2x8x32xbf16, #tpu.memory_space<vmem>>, %arg7: memref<1x8x128xf32, #tpu.memory_space<vmem>>) attributes {dimension_semantics = [#tpu.dimension_semantics<parallel>], iteration_bounds = array<i64: 1>, scalar_prefetch = 0 : i64, scratch_operands = 0 : i64, tpu.core_type = #tpu.core_type<tc>, window_params = [{pipeline_mode = #tpu.pipeline_mode<synchronous>, transform_indices = @transform_0, window_bounds = array<i64: 1, 2>}, {pipeline_mode = #tpu.pipeline_mode<synchronous>, transform_indices = @transform_1, window_bounds = array<i64: 1, 2>}, {pipeline_mode = #tpu.pipeline_mode<synchronous>, transform_indices = @transform_2, window_bounds = array<i64: 1, 2>}, {pipeline_mode = #tpu.pipeline_mode<synchronous>, transform_indices = @transform_3, window_bounds = array<i64: 1, 2>}, {transform_indices = @transform_4, window_bounds = array<i64: 2, 8, 32>}, {transform_indices = @transform_5, window_bounds = array<i64: 2, 8, 32>}, {transform_indices = @transform_6, window_bounds = array<i64: 1, 8, 128>}]} {
    %c0 = arith.constant 0 : index
    %c0_0 = arith.constant 0 : index
    %c0_1 = arith.constant 0 : index
    %0 = vector.load %arg5[%c0, %c0_0, %c0_1] : memref<2x8x32xbf16, #tpu.memory_space<vmem>>, vector<2x1x32xbf16>
    %1 = vector.shape_cast %0 : vector<2x1x32xbf16> to vector<2x32xbf16>
    %2 = arith.extf %1 : vector<2x32xbf16> to vector<2x32xf32>
    %c0_2 = arith.constant 0 : index
    %c1 = arith.constant 1 : index
    %c0_3 = arith.constant 0 : index
    %3 = vector.load %arg5[%c0_2, %c1, %c0_3] : memref<2x8x32xbf16, #tpu.memory_space<vmem>>, vector<2x1x32xbf16>
    %4 = vector.shape_cast %3 : vector<2x1x32xbf16> to vector<2x32xbf16>
    %5 = arith.extf %4 : vector<2x32xbf16> to vector<2x32xf32>
    %c0_4 = arith.constant 0 : index
    %c2 = arith.constant 2 : index
    %c0_5 = arith.constant 0 : index
    %6 = vector.load %arg5[%c0_4, %c2, %c0_5] : memref<2x8x32xbf16, #tpu.memory_space<vmem>>, vector<2x1x32xbf16>
    %7 = vector.shape_cast %6 : vector<2x1x32xbf16> to vector<2x32xbf16>
    %8 = arith.extf %7 : vector<2x32xbf16> to vector<2x32xf32>
    %9 = arith.addf %2, %8 : vector<2x32xf32>
    %c0_6 = arith.constant 0 : index
    %c4 = arith.constant 4 : index
    %c0_7 = arith.constant 0 : index
    %10 = vector.load %arg5[%c0_6, %c4, %c0_7] : memref<2x8x32xbf16, #tpu.memory_space<vmem>>, vector<2x1x32xbf16>
    %11 = vector.shape_cast %10 : vector<2x1x32xbf16> to vector<2x32xbf16>
    %12 = arith.extf %11 : vector<2x32xbf16> to vector<2x32xf32>
    %13 = arith.addf %9, %12 : vector<2x32xf32>
    %c0_8 = arith.constant 0 : index
    %c6 = arith.constant 6 : index
    %c0_9 = arith.constant 0 : index
    %14 = vector.load %arg5[%c0_8, %c6, %c0_9] : memref<2x8x32xbf16, #tpu.memory_space<vmem>>, vector<2x1x32xbf16>
    %15 = vector.shape_cast %14 : vector<2x1x32xbf16> to vector<2x32xbf16>
    %16 = arith.extf %15 : vector<2x32xbf16> to vector<2x32xf32>
    %17 = arith.addf %13, %16 : vector<2x32xf32>
    %c0_10 = arith.constant 0 : index
    %c3 = arith.constant 3 : index
    %c0_11 = arith.constant 0 : index
    %18 = vector.load %arg5[%c0_10, %c3, %c0_11] : memref<2x8x32xbf16, #tpu.memory_space<vmem>>, vector<2x1x32xbf16>
    %19 = vector.shape_cast %18 : vector<2x1x32xbf16> to vector<2x32xbf16>
    %20 = arith.extf %19 : vector<2x32xbf16> to vector<2x32xf32>
    %21 = arith.addf %5, %20 : vector<2x32xf32>
    %c0_12 = arith.constant 0 : index
    %c5 = arith.constant 5 : index
    %c0_13 = arith.constant 0 : index
    %22 = vector.load %arg5[%c0_12, %c5, %c0_13] : memref<2x8x32xbf16, #tpu.memory_space<vmem>>, vector<2x1x32xbf16>
    %23 = vector.shape_cast %22 : vector<2x1x32xbf16> to vector<2x32xbf16>
    %24 = arith.extf %23 : vector<2x32xbf16> to vector<2x32xf32>
    %25 = arith.addf %21, %24 : vector<2x32xf32>
    %c0_14 = arith.constant 0 : index
    %c7 = arith.constant 7 : index
    %c0_15 = arith.constant 0 : index
    %26 = vector.load %arg5[%c0_14, %c7, %c0_15] : memref<2x8x32xbf16, #tpu.memory_space<vmem>>, vector<2x1x32xbf16>
    %27 = vector.shape_cast %26 : vector<2x1x32xbf16> to vector<2x32xbf16>
    %28 = arith.extf %27 : vector<2x32xbf16> to vector<2x32xf32>
    %29 = arith.addf %25, %28 : vector<2x32xf32>
    %30 = arith.addf %17, %29 : vector<2x32xf32>
    %cst = arith.constant 1.250000e-01 : f32
    %31 = vector.broadcast %cst : f32 to vector<2x32xf32>
    %32 = arith.mulf %30, %31 : vector<2x32xf32>
    %33 = arith.mulf %32, %32 : vector<2x32xf32>
    %cst_16 = arith.constant dense<0.000000e+00> : vector<2xf32>
    %34 = vector.multi_reduction <add>, %33, %cst_16 [1] : vector<2x32xf32> to vector<2xf32>
    %35 = vector.shape_cast %34 : vector<2xf32> to vector<2x1xf32>
    %36 = math.sqrt %35 : vector<2x1xf32>
    %c0_17 = arith.constant 0 : index
    %c0_18 = arith.constant 0 : index
    %c0_19 = arith.constant 0 : index
    %37 = vector.load %arg6[%c0_17, %c0_18, %c0_19] : memref<2x8x32xbf16, #tpu.memory_space<vmem>>, vector<2x1x32xbf16>
    %38 = vector.shape_cast %37 : vector<2x1x32xbf16> to vector<2x32xbf16>
    %39 = arith.extf %38 : vector<2x32xbf16> to vector<2x32xf32>
    %c0_20 = arith.constant 0 : index
    %c1_21 = arith.constant 1 : index
    %c0_22 = arith.constant 0 : index
    %40 = vector.load %arg6[%c0_20, %c1_21, %c0_22] : memref<2x8x32xbf16, #tpu.memory_space<vmem>>, vector<2x1x32xbf16>
    %41 = vector.shape_cast %40 : vector<2x1x32xbf16> to vector<2x32xbf16>
    %42 = arith.extf %41 : vector<2x32xbf16> to vector<2x32xf32>
    %c0_23 = arith.constant 0 : index
    %c2_24 = arith.constant 2 : index
    %c0_25 = arith.constant 0 : index
    %43 = vector.load %arg6[%c0_23, %c2_24, %c0_25] : memref<2x8x32xbf16, #tpu.memory_space<vmem>>, vector<2x1x32xbf16>
    %44 = vector.shape_cast %43 : vector<2x1x32xbf16> to vector<2x32xbf16>
    %45 = arith.extf %44 : vector<2x32xbf16> to vector<2x32xf32>
    %46 = arith.addf %39, %45 : vector<2x32xf32>
    %c0_26 = arith.constant 0 : index
    %c4_27 = arith.constant 4 : index
    %c0_28 = arith.constant 0 : index
    %47 = vector.load %arg6[%c0_26, %c4_27, %c0_28] : memref<2x8x32xbf16, #tpu.memory_space<vmem>>, vector<2x1x32xbf16>
    %48 = vector.shape_cast %47 : vector<2x1x32xbf16> to vector<2x32xbf16>
    %49 = arith.extf %48 : vector<2x32xbf16> to vector<2x32xf32>
    %50 = arith.addf %46, %49 : vector<2x32xf32>
    %c0_29 = arith.constant 0 : index
    %c6_30 = arith.constant 6 : index
    %c0_31 = arith.constant 0 : index
    %51 = vector.load %arg6[%c0_29, %c6_30, %c0_31] : memref<2x8x32xbf16, #tpu.memory_space<vmem>>, vector<2x1x32xbf16>
    %52 = vector.shape_cast %51 : vector<2x1x32xbf16> to vector<2x32xbf16>
    %53 = arith.extf %52 : vector<2x32xbf16> to vector<2x32xf32>
    %54 = arith.addf %50, %53 : vector<2x32xf32>
    %c0_32 = arith.constant 0 : index
    %c3_33 = arith.constant 3 : index
    %c0_34 = arith.constant 0 : index
    %55 = vector.load %arg6[%c0_32, %c3_33, %c0_34] : memref<2x8x32xbf16, #tpu.memory_space<vmem>>, vector<2x1x32xbf16>
    %56 = vector.shape_cast %55 : vector<2x1x32xbf16> to vector<2x32xbf16>
    %57 = arith.extf %56 : vector<2x32xbf16> to vector<2x32xf32>
    %58 = arith.addf %42, %57 : vector<2x32xf32>
    %c0_35 = arith.constant 0 : index
    %c5_36 = arith.constant 5 : index
    %c0_37 = arith.constant 0 : index
    %59 = vector.load %arg6[%c0_35, %c5_36, %c0_37] : memref<2x8x32xbf16, #tpu.memory_space<vmem>>, vector<2x1x32xbf16>
    %60 = vector.shape_cast %59 : vector<2x1x32xbf16> to vector<2x32xbf16>
    %61 = arith.extf %60 : vector<2x32xbf16> to vector<2x32xf32>
    %62 = arith.addf %58, %61 : vector<2x32xf32>
    %c0_38 = arith.constant 0 : index
    %c7_39 = arith.constant 7 : index
    %c0_40 = arith.constant 0 : index
    %63 = vector.load %arg6[%c0_38, %c7_39, %c0_40] : memref<2x8x32xbf16, #tpu.memory_space<vmem>>, vector<2x1x32xbf16>
    %64 = vector.shape_cast %63 : vector<2x1x32xbf16> to vector<2x32xbf16>
    %65 = arith.extf %64 : vector<2x32xbf16> to vector<2x32xf32>
    %66 = arith.addf %62, %65 : vector<2x32xf32>
    %67 = arith.addf %54, %66 : vector<2x32xf32>
    %cst_41 = arith.constant 1.250000e-01 : f32
    %68 = vector.broadcast %cst_41 : f32 to vector<2x32xf32>
    %69 = arith.mulf %67, %68 : vector<2x32xf32>
    %70 = arith.mulf %69, %69 : vector<2x32xf32>
    %cst_42 = arith.constant dense<0.000000e+00> : vector<2xf32>
    %71 = vector.multi_reduction <add>, %70, %cst_42 [1] : vector<2x32xf32> to vector<2xf32>
    %72 = vector.shape_cast %71 : vector<2xf32> to vector<2x1xf32>
    %73 = math.sqrt %72 : vector<2x1xf32>
    %cst_43 = arith.constant 1.000000e+02 : f32
    %74 = vector.broadcast %cst_43 : f32 to vector<2x1xf32>
    %75 = arith.subf %74, %73 : vector<2x1xf32>
    %76 = math.absf %75 : vector<2x1xf32>
    %77 = arith.addf %76, %36 : vector<2x1xf32>
    %78 = tpu.iota {dimensions = array<i32: 0>} : vector<2x1xi32>
    %c2_i32 = arith.constant 2 : i32
    %79 = arith.muli %arg0, %c2_i32 : i32
    %80 = vector.broadcast %79 : i32 to vector<2x1xi32>
    %81 = arith.addi %78, %80 : vector<2x1xi32>
    %c2_i32_44 = arith.constant 2 : i32
    %82 = vector.broadcast %c2_i32_44 : i32 to vector<2x1xi32>
    %83 = arith.cmpi slt, %81, %82 : vector<2x1xi32>
    %cst_45 = arith.constant 0.000000e+00 : f32
    %84 = vector.broadcast %cst_45 : f32 to vector<2x1xf32>
    %85 = arith.select %83, %77, %84 : vector<2x1xi1>, vector<2x1xf32>
    %86 = arith.mulf %85, %85 : vector<2x1xf32>
    %cst_46 = arith.constant dense<0.000000e+00> : vector<1xf32>
    %87 = vector.multi_reduction <add>, %86, %cst_46 [0] : vector<2x1xf32> to vector<1xf32>
    %88 = vector.shape_cast %87 : vector<1xf32> to vector<1x1xf32>
    %cst_47 = arith.constant 5.000000e-05 : f32
    %89 = vector.broadcast %cst_47 : f32 to vector<1x1xf32>
    %90 = arith.mulf %88, %89 : vector<1x1xf32>
    %91 = vector.shape_cast %90 : vector<1x1xf32> to vector<1x1x1xf32>
    %92 = vector.broadcast %91 : vector<1x1x1xf32> to vector<1x8x128xf32>
    %c0_48 = arith.constant 0 : index
    %c0_49 = arith.constant 0 : index
    %c0_50 = arith.constant 0 : index
    %93 = vector.load %arg7[%c0_48, %c0_49, %c0_50] : memref<1x8x128xf32, #tpu.memory_space<vmem>>, vector<1x8x128xf32>
    tpu.vector_store %arg7[%c0_48, %c0_49, %c0_50], %92 {strides = array<i32>} : memref<1x8x128xf32, #tpu.memory_space<vmem>>, vector<1x8x128xf32>,
    %c0_i32 = arith.constant 0 : i32
    %94 = arith.cmpi eq, %arg0, %c0_i32 : i32
    %95 = arith.extui %94 : i1 to i32
    %c0_i32_51 = arith.constant 0 : i32
    %96 = arith.cmpi ne, %95, %c0_i32_51 : i32
    scf.if %96 {
      %c0_52 = arith.constant 0 : index
      %c0_53 = arith.constant 0 : index
      %97 = vector.load %arg1[%c0_52, %c0_53] : memref<1x2xf32, #tpu.memory_space<vmem>>, vector<1x2xf32>
      %c0_54 = arith.constant 0 : index
      %c0_55 = arith.constant 0 : index
      %98 = vector.load %arg3[%c0_54, %c0_55] : memref<1x2xf32, #tpu.memory_space<vmem>>, vector<1x2xf32>
      %99 = math.log %97 : vector<1x2xf32>
      %cst_56 = arith.constant -1.000000e+02 : f32
      %100 = vector.broadcast %cst_56 : f32 to vector<1x2xf32>
      %101 = arith.maximumf %99, %100 : vector<1x2xf32>
      %cst_57 = arith.constant 1.000000e+00 : f32
      %102 = vector.broadcast %cst_57 : f32 to vector<1x2xf32>
      %103 = arith.subf %102, %97 : vector<1x2xf32>
      %104 = math.log %103 : vector<1x2xf32>
      %cst_58 = arith.constant -1.000000e+02 : f32
      %105 = vector.broadcast %cst_58 : f32 to vector<1x2xf32>
      %106 = arith.maximumf %104, %105 : vector<1x2xf32>
      %107 = arith.mulf %98, %101 : vector<1x2xf32>
      %cst_59 = arith.constant 1.000000e+00 : f32
      %108 = vector.broadcast %cst_59 : f32 to vector<1x2xf32>
      %109 = arith.subf %108, %98 : vector<1x2xf32>
      %110 = arith.mulf %109, %106 : vector<1x2xf32>
      %111 = arith.addf %107, %110 : vector<1x2xf32>
      %cst_60 = arith.constant 0.000000e+00 : f32
      %112 = vector.broadcast %cst_60 : f32 to vector<1x2xf32>
      %113 = arith.subf %112, %111 : vector<1x2xf32>
      %cst_61 = arith.constant dense<0.000000e+00> : vector<1xf32>
      %114 = vector.multi_reduction <add>, %113, %cst_61 [1] : vector<1x2xf32> to vector<1xf32>
      %115 = vector.shape_cast %114 : vector<1xf32> to vector<1x1xf32>
      %c0_62 = arith.constant 0 : index
      %c0_63 = arith.constant 0 : index
      %116 = vector.load %arg2[%c0_62, %c0_63] : memref<1x2xf32, #tpu.memory_space<vmem>>, vector<1x2xf32>
      %c0_64 = arith.constant 0 : index
      %c0_65 = arith.constant 0 : index
      %117 = vector.load %arg4[%c0_64, %c0_65] : memref<1x2xf32, #tpu.memory_space<vmem>>, vector<1x2xf32>
      %118 = math.log %116 : vector<1x2xf32>
      %cst_66 = arith.constant -1.000000e+02 : f32
      %119 = vector.broadcast %cst_66 : f32 to vector<1x2xf32>
      %120 = arith.maximumf %118, %119 : vector<1x2xf32>
      %cst_67 = arith.constant 1.000000e+00 : f32
      %121 = vector.broadcast %cst_67 : f32 to vector<1x2xf32>
      %122 = arith.subf %121, %116 : vector<1x2xf32>
      %123 = math.log %122 : vector<1x2xf32>
      %cst_68 = arith.constant -1.000000e+02 : f32
      %124 = vector.broadcast %cst_68 : f32 to vector<1x2xf32>
      %125 = arith.maximumf %123, %124 : vector<1x2xf32>
      %126 = arith.mulf %117, %120 : vector<1x2xf32>
      %cst_69 = arith.constant 1.000000e+00 : f32
      %127 = vector.broadcast %cst_69 : f32 to vector<1x2xf32>
      %128 = arith.subf %127, %117 : vector<1x2xf32>
      %129 = arith.mulf %128, %125 : vector<1x2xf32>
      %130 = arith.addf %126, %129 : vector<1x2xf32>
      %cst_70 = arith.constant 0.000000e+00 : f32
      %131 = vector.broadcast %cst_70 : f32 to vector<1x2xf32>
      %132 = arith.subf %131, %130 : vector<1x2xf32>
      %cst_71 = arith.constant dense<0.000000e+00> : vector<1xf32>
      %133 = vector.multi_reduction <add>, %132, %cst_71 [1] : vector<1x2xf32> to vector<1xf32>
      %134 = vector.shape_cast %133 : vector<1xf32> to vector<1x1xf32>
      %135 = arith.addf %115, %134 : vector<1x1xf32>
      %cst_72 = arith.constant 2.500000e-01 : f32
      %136 = vector.broadcast %cst_72 : f32 to vector<1x1xf32>
      %137 = arith.mulf %135, %136 : vector<1x1xf32>
      %c0_73 = arith.constant 0 : index
      %c0_74 = arith.constant 0 : index
      %c0_75 = arith.constant 0 : index
      %138 = vector.load %arg7[%c0_73, %c0_74, %c0_75] : memref<1x8x128xf32, #tpu.memory_space<vmem>>, vector<1x8x128xf32>
      %139 = vector.shape_cast %137 : vector<1x1xf32> to vector<1x1x1xf32>
      %140 = vector.broadcast %139 : vector<1x1x1xf32> to vector<1x8x128xf32>
      %141 = arith.addf %138, %140 : vector<1x8x128xf32>
      %c0_76 = arith.constant 0 : index
      %c0_77 = arith.constant 0 : index
      %c0_78 = arith.constant 0 : index
      %142 = vector.load %arg7[%c0_76, %c0_77, %c0_78] : memref<1x8x128xf32, #tpu.memory_space<vmem>>, vector<1x8x128xf32>
      tpu.vector_store %arg7[%c0_76, %c0_77, %c0_78], %141 {strides = array<i32>} : memref<1x8x128xf32, #tpu.memory_space<vmem>>, vector<1x8x128xf32>,
    } else {
    }
    return
  }
  func.func @transform_0(%arg0: i32) -> (i32, i32) {
    %c0_i32 = arith.constant 0 : i32
    %c0_i32_0 = arith.constant 0 : i32
    %c0_i32_1 = arith.constant 0 : i32
    return %c0_i32, %c0_i32_0 : i32, i32
  }
  func.func @transform_1(%arg0: i32) -> (i32, i32) {
    %c0_i32 = arith.constant 0 : i32
    %c0_i32_0 = arith.constant 0 : i32
    %c0_i32_1 = arith.constant 0 : i32
    return %c0_i32, %c0_i32_0 : i32, i32
  }
  func.func @transform_2(%arg0: i32) -> (i32, i32) {
    %c0_i32 = arith.constant 0 : i32
    %c0_i32_0 = arith.constant 0 : i32
    %c0_i32_1 = arith.constant 0 : i32
    return %c0_i32, %c0_i32_0 : i32, i32
  }
  func.func @transform_3(%arg0: i32) -> (i32, i32) {
    %c0_i32 = arith.constant 0 : i32
    %c0_i32_0 = arith.constant 0 : i32
    %c0_i32_1 = arith.constant 0 : i32
    return %c0_i32, %c0_i32_0 : i32, i32
  }
  func.func @transform_4(%arg0: i32) -> (i32, i32, i32) {
    %c0_i32 = arith.constant 0 : i32
    %c0_i32_0 = arith.constant 0 : i32
    %c0_i32_1 = arith.constant 0 : i32
    return %arg0, %c0_i32, %c0_i32_0 : i32, i32, i32
  }
  func.func @transform_5(%arg0: i32) -> (i32, i32, i32) {
    %c0_i32 = arith.constant 0 : i32
    %c0_i32_0 = arith.constant 0 : i32
    %c0_i32_1 = arith.constant 0 : i32
    return %arg0, %c0_i32, %c0_i32_0 : i32, i32, i32
  }
  func.func @transform_6(%arg0: i32) -> (i32, i32, i32) {
    %c0_i32 = arith.constant 0 : i32
    %c0_i32_0 = arith.constant 0 : i32
    %c0_i32_1 = arith.constant 0 : i32
    return %arg0, %c0_i32, %c0_i32_0 : i32, i32, i32
  }
}

</mosaic_0001>

<bundles_post_ra>
// kernel: tpu_custom_call.1
= control target key start
LH: loop header
LB: loop body
LE: loop exit
PB: predicated region body
PF: predicated region fallthrough
CT: control target
= control target key end

     0   :  { %11 = vsyncpa [#allocation3], 0  ;;  %s510_s0 = inlined_call_operand.hbm [shape: f32[1,2], index: 0, kind: input, shape index: {}]   ;;  %s511_s1 = inlined_call_operand.vmem [shape: f32[1,2], index: 1, kind: input, shape index: {}]   ;;  %s512_s2 = inlined_call_operand.hbm [shape: f32[1,2], index: 2, kind: input, shape index: {}]   ;;  %s513_s3 = inlined_call_operand.hbm [shape: f32[1,2], index: 3, kind: input, shape index: {}]   ;;  %s514_s4 = inlined_call_operand.hbm [shape: bf16[2,8,32], index: 4, kind: input, shape index: {}]   ;;  %s515_s5 = inlined_call_operand.vmem [shape: bf16[2,8,32], index: 5, kind: input, shape index: {}]   ;;  %s516_s6 = inlined_call_operand.hbm [shape: f32[1,8,128], index: 6, kind: output, shape index: {}]  }
   0x1   :  { %12 = vsyncpa [#allocation6], 0 }
   0x2   :  { %13 = vsyncpa [#allocation9], 0 }
   0x3   :  { %14 = vsyncpa [#allocation4], 0  ;;  %s422_s21 = smov [#allocation5]   ;;  %s423_s23 = smov [#allocation2]  }
   0x4   :  { %s33_s22 = sshll.u32 %s422_s21, 4  ;;  %s21_s24 = sshll.u32 %s423_s23, 4  ;;  %s34_s22 = int_to_ptr.vmem [resolvable:$true] %s33_s22  ;;  %s22_s24 = int_to_ptr.vmem [resolvable:$true] %s21_s24 }
   0x5   :  { %s322_s25 = scalar_lea.vmem %s34_s22, 16  ;;  %s326_s26 = scalar_lea.vmem %s34_s22, 32 }
   0x6   :  { %p323_p0 = scmp.ne.s32.totalorder %s34_s22, %s322_s25  ;;  %p327_p1 = scmp.lt.s32.totalorder %s34_s22, %s34_s22 }
   0x7   :  { %p328_p2 = scmp.lt.s32.totalorder %s326_s26, %s322_s25 }
   0x9   :  { %p329_p3 = por %p328_p2, %p327_p1 }
   0xb   :  { %p330_p4 = pnand %p329_p3, %p323_p0 }
   0xd   :  { %333 = shalt.err (!%p330_p4)
}
   0xe   :  { %36 = dma.hbm_to_vmem [thread:$0]  %s512_s2, 16, %s34_s22, [#allocation6]  }
   0xf   :  { %s342_s29 = scalar_lea.vmem %s22_s24, 16  ;;  %s346_s30 = scalar_lea.vmem %s22_s24, 32 }
  0x10   :  { %p343_p5 = scmp.ne.s32.totalorder %s22_s24, %s342_s29  ;;  %p347_p6 = scmp.lt.s32.totalorder %s22_s24, %s22_s24 }
  0x11   :  { %p348_p7 = scmp.lt.s32.totalorder %s346_s30, %s342_s29 }
  0x13   :  { %p349_p8 = por %p348_p7, %p347_p6 }
  0x15   :  { %p350_p9 = pnand %p349_p8, %p343_p5 }
  0x17   :  { %353 = shalt.err (!%p350_p9)
}
  0x18   :  { %24 = dma.hbm_to_vmem [thread:$0]  %s510_s0, 16, %s22_s24, [#allocation3]  }
  0x19   :  { %s424_s9 = smov [#allocation7]   ;;  %s425_s11 = smov [#allocation8]  }
  0x1a   :  { %s43_s10 = sshll.u32 %s424_s9, 4  ;;  %s52_s12 = sshll.u32 %s425_s11, 4  ;;  %s44_s10 = int_to_ptr.vmem [resolvable:$true] %s43_s10  ;;  %s53_s12 = int_to_ptr.vmem [resolvable:$true] %s52_s12 }
  0x1b   :  { %s362_s13 = scalar_lea.vmem %s44_s10, 16  ;;  %s366_s2 = scalar_lea.vmem %s44_s10, 32 }
  0x1c   :  { %p363_p10 = scmp.ne.s32.totalorder %s44_s10, %s362_s13  ;;  %p367_p11 = scmp.lt.s32.totalorder %s44_s10, %s44_s10 }
  0x1d   :  { %p368_p12 = scmp.lt.s32.totalorder %s366_s2, %s362_s13 }
  0x1f   :  { %p369_p13 = por %p368_p12, %p367_p11 }
  0x21   :  { %p370_p0 = pnand %p369_p13, %p363_p10 }
  0x23   :  { %373 = shalt.err (!%p370_p0)
}
  0x24   :  { %46 = dma.hbm_to_vmem [thread:$0]  %s513_s3, 16, %s44_s10, [#allocation6]  }
  0x25   :  { %s382_s16 = scalar_lea.vmem %s53_s12, 128  ;;  %p387_p2 = scmp.lt.s32.totalorder %s53_s12, %s53_s12 }
  0x26   :  { %p383_p1 = scmp.ne.s32.totalorder %s53_s12, %s382_s16  ;;  %p388_p3 = scmp.lt.s32.totalorder %s382_s16, %s382_s16 }
  0x28   :  { %p389_p4 = por %p388_p3, %p387_p2 }
  0x2a   :  { %p390_p5 = pnand %p389_p4, %p383_p1 }
  0x2c   :  { %393 = shalt.err (!%p390_p5)
}
  0x2d   :  { %s426_s0 = smov 64   ;;  %s427_s17 = smov 4  }
  0x2e   :  { %58 = dma.hbm_to_vmem [thread:$0]  %s514_s4, 128, %s53_s12, [#allocation9], %s426_s0, %s426_s0, %s427_s17  }
  0x2f   :  { %414 = dma.done.wait [#allocation3], 16  }
  0x30   :  { %415 = vsyncadd [#allocation3], 4294967280 }
  0x31   :  { %416 = dma.done.wait [#allocation6], 32  }
  0x32   :  { %417 = vsyncadd [#allocation6], 4294967264 }
  0x33   :  { %418 = dma.done.wait [#allocation9], 128  }
  0x34   :  { %419 = vsyncadd [#allocation9], 4294967168  ;;  %v142_v0 = vld [vmem:[%s515_s5] sm:$0x1]  ;;  %v143_v1 = vld [vmem:[%s515_s5 + $0x4] sm:$0x1] }
  0x35   :  { %v146_v2 = vld [vmem:[%s515_s5] sm:$0x2]  ;;  %v144_v3 = vunpack.c.l.bf16 %v142_v0  ;;  %v147_v4 = vld [vmem:[%s515_s5 + $0x4] sm:$0x2]  ;;  %v158_v6 = vld [vmem:[%s515_s5] sm:$0x4]  ;;  %v145_v8 = vunpack.c.l.bf16 %v143_v1 }
  0x36   :  { %v148_v5 = vunpack.c.l.bf16 %v146_v2  ;;  %v159_v7 = vld [vmem:[%s515_s5 + $0x4] sm:$0x4]  ;;  %v149_v9 = vunpack.c.l.bf16 %v147_v4  ;;  %v160_v10 = vunpack.c.l.bf16 %v158_v6  ;;  %v170_v12 = vld [vmem:[%s515_s5] sm:$0x8]  ;;  %v171_v13 = vld [vmem:[%s515_s5 + $0x4] sm:$0x8] }
  0x37   :  { %v161_v11 = vunpack.c.l.bf16 %v159_v7  ;;  %v73_v14 = vld [vmem:[#allocation8] sm:$0x1]  ;;  %v172_v16 = vunpack.c.l.bf16 %v170_v12  ;;  %v173_v17 = vunpack.c.l.bf16 %v171_v13  ;;  %v74_v18 = vld [vmem:[#allocation8 + $0x4] sm:$0x1]  ;;  %v77_v20 = vld [vmem:[#allocation8] sm:$0x2] }
  0x38   :  { %v152_v15 = vrot.slane %v148_v5, 2  ;;  %v75_v19 = vunpack.c.l.bf16 %v73_v14  ;;  %v153_v21 = vrot.slane %v149_v9, 2  ;;  %v164_v22 = vrot.slane %v160_v10, 4  ;;  %v78_v25 = vld [vmem:[#allocation8 + $0x4] sm:$0x2] }
  0x39   :  { %v165_v23 = vrot.slane %v161_v11, 4  ;;  %v76_v24 = vunpack.c.l.bf16 %v74_v18  ;;  %v176_v27 = vrot.slane %v172_v16, 6  ;;  %v177_v28 = vrot.slane %v173_v17, 6  ;;  %v89_v30 = vld [vmem:[#allocation8] sm:$0x4] }
  0x3a   :  { %v156_v26 = vadd.f32 %v152_v15, %v144_v3  ;;  %v79_v29 = vunpack.c.l.bf16 %v77_v20  ;;  %v90_v31 = vld [vmem:[#allocation8 + $0x4] sm:$0x4]  ;;  %v157_v32 = vadd.f32 %v153_v21, %v145_v8  ;;  %v80_v33 = vunpack.c.l.bf16 %v78_v25  ;;  %v101_v36 = vld [vmem:[#allocation8] sm:$0x8]  ;;  %v102_v37 = vld [vmem:[#allocation8 + $0x4] sm:$0x8] }
  0x3b   :  { %v91_v34 = vunpack.c.l.bf16 %v89_v30  ;;  %v92_v35 = vunpack.c.l.bf16 %v90_v31  ;;  %v103_v40 = vunpack.c.l.bf16 %v101_v36  ;;  %v104_v41 = vunpack.c.l.bf16 %v102_v37  ;;  %v234_v42 = vld [vmem:[#allocation2] sm:$0x1]  ;;  %v252_v51 = vld [vmem:[%s511_s1] sm:$0x1]  ;;  %v235_v16 = vld [vmem:[#allocation5] sm:$0x1] }
  0x3c   :  { %v168_v38 = vadd.f32 %v164_v22, %v156_v26  ;;  %v83_v39 = vrot.slane %v79_v29, 2  ;;  %v169_v43 = vadd.f32 %v165_v23, %v157_v32  ;;  %v84_v44 = vrot.slane %v80_v33, 2  ;;  %v253_v21 = vld [vmem:[#allocation7] sm:$0x1]  ;;  %s428_s1 = smov [#allocation10]  }
  0x3d   :  { %v95_v45 = vrot.slane %v91_v34, 4  ;;  %v96_v46 = vrot.slane %v92_v35, 4  ;;  %v107_v49 = vrot.slane %v103_v40, 6  ;;  %v108_v50 = vrot.slane %v104_v41, 6  ;;  %s284_s11 = sshll.u32 %s428_s1, 4  ;;  %s285_s11 = int_to_ptr.vmem [resolvable:$true] %s284_s11 }
  0x3e   :  { %v180_v47 = vadd.f32 %v176_v27, %v168_v38  ;;  %v87_v48 = vadd.f32 %v83_v39, %v75_v19  ;;  %v181_v52 = vadd.f32 %v177_v28, %v169_v43  ;;  %v88_v53 = vadd.f32 %v84_v44, %v76_v24  ;;  %s394_s12 = scalar_lea.vmem %s285_s11, 128  ;;  %p399_p7 = scmp.lt.s32.totalorder %s285_s11, %s285_s11 }
  0x3f   :  { %302 = vlog2.f32 %v234_v42  ;;  %v239_v54 = vsub.f32 1.0, %v234_v42  ;;  %v257_v59 = vsub.f32 1.0, %v252_v51  ;;  %vm128_vm0 = vcmask 1041409   ;;  %p395_p6 = scmp.ne.s32.totalorder %s285_s11, %s394_s12  ;;  %p400_p8 = scmp.lt.s32.totalorder %s394_s12, %s394_s12 }
  0x40   :  { %v184_v55 = vrot.slane %v180_v47, 1  ;;  %v99_v56 = vadd.f32 %v95_v45, %v87_v48  ;;  %304 = vlog2.f32 %v252_v51  ;;  %v185_v57 = vrot.slane %v181_v52, 1 }
  0x41   :  { %v100_v58 = vadd.f32 %v96_v46, %v88_v53  ;;  %306 = vlog2.f32 %v239_v54  ;;  %vm131_vm1 = vcmask 254976   ;;  %v244_v26 = vsub.f32 1.0, %v235_v16  ;;  %p401_p9 = por %p400_p8, %p399_p7 }
  0x42   :  { %v188_v60 = vadd.f32 %v184_v55, %v180_v47  ;;  %v111_v61 = vadd.f32 %v107_v49, %v99_v56  ;;  %v189_v62 = vadd.f32 %v185_v57, %v181_v52  ;;  %308 = vlog2.f32 %v257_v59 }
  0x43   :  { %v112_v63 = vadd.f32 %v108_v50, %v100_v58  ;;  %v262_v33 = vsub.f32 1.0, %v253_v21  ;;  %vm248_vm2 = vcmask 8192   ;;  %v212_v47 = vlaneseq  ;;  %p402_p10 = pnand %p401_p9, %p395_p6 }
  0x44   :  { %v190_v0 = vmul.f32 0.125, %v188_v60  ;;  %v115_v1 = vrot.slane %v111_v61, 1  ;;  %v191_v2 = vmul.f32 0.125, %v189_v62  ;;  %vm220_vm8 = vcmask 1041408  }
  0x45   :  { %v116_v3 = vrot.slane %v112_v63, 1  ;;  %v213_v53 = vshrl.u32 %v212_v47, 7 }
  0x46   :  { %v119_v4 = vadd.f32 %v115_v1, %v111_v61  ;;  %v192_v5 = vmul.f32 %v190_v0, %v190_v0  ;;  %v193_v6 = vmul.f32 %v191_v2, %v191_v2 }
  0x47   :  { %v120_v7 = vadd.f32 %v116_v3, %v112_v63  ;;  %vm217_vm7 = vcmp.lt.s32.totalorder %v213_v53, 2 }
  0x48   :  { %v121_v8 = vmul.f32 0.125, %v119_v4  ;;  %v196_v9 = vrot.slane %v193_v6, 7 }
  0x49   :  { %v122_v10 = vmul.f32 0.125, %v120_v7 }
  0x4a   :  { %v197_v11 = vsel %vm128_vm0, %v196_v9, %v192_v5  ;;  %v123_v12 = vmul.f32 %v121_v8, %v121_v8  ;;  %v274_v8 = vsub.s32 0, %v213_v53 }
  0x4b   :  { %v124_v13 = vmul.f32 %v122_v10, %v122_v10  ;;  %v199_v15 = vsel %vm131_vm1, %v197_v11, 0.0 }
  0x4c   :  { %v303_v14 = vpop.eup %302  ;;  %200 = vadd.xlane.f32.xlu0 %v199_v15 }
  0x4d   :  { %v305_v17 = vpop.eup %304  ;;  %v127_v18 = vrot.slane %v124_v13, 7  ;;  %v237_v19 = vmul.f32 0.6931472, %v303_v14 }
  0x4e   :  { %v307_v20 = vpop.eup %306  ;;  %v255_v22 = vmul.f32 0.6931472, %v305_v17 }
  0x4f   :  { %v129_v23 = vsel %vm128_vm0, %v127_v18, %v123_v12  ;;  %v238_v24 = vmax.f32 %v237_v19, -100.0  ;;  %v241_v25 = vmul.f32 0.6931472, %v307_v20  ;;  %v309_v27 = vpop.eup %308 }
  0x50   :  { %v132_v28 = vsel %vm131_vm1, %v129_v23, 0.0  ;;  %v256_v29 = vmax.f32 %v255_v22, -100.0  ;;  %v259_v32 = vmul.f32 0.6931472, %v309_v27 }
  0x51   :  { %133 = vadd.xlane.f32.xlu0 %v132_v28  ;;  %v242_v30 = vmax.f32 %v241_v25, -100.0  ;;  %v243_v31 = vmul.f32 %v238_v24, %v235_v16 }
  0x52   :  { %v260_v35 = vmax.f32 %v259_v32, -100.0  ;;  %v261_v36 = vmul.f32 %v256_v29, %v253_v21 }
  0x53   :  { %v245_v34 = vmul.f32 %v244_v26, %v242_v30 }
  0x54   :  { %v263_v38 = vmul.f32 %v262_v33, %v260_v35 }
  0x55   :  { %v246_v37 = vadd.f32 %v245_v34, %v243_v31 }
  0x56   :  { %v264_v40 = vadd.f32 %v263_v38, %v261_v36 }
  0x57   :  { %v247_v39 = vsub.f32 0.0, %v246_v37 }
  0x58   :  { %v265_v42 = vsub.f32 0.0, %v264_v40 }
  0x59   :  { %v249_v41 = vsel %vm248_vm2, %v247_v39, 0.0 }
  0x5a   :  { %250 = vadd.xlane.f32.xlu1 %v249_v41  ;;  %v266_v43 = vsel %vm248_vm2, %v265_v42, 0.0 }
  0x5e   :  { %267 = vadd.xlane.f32.xlu1 %v266_v43 }
  0xd5   :  { %v201_v44 = vpop.xlane.xlu0 %200 }
  0xd6   :  { %310 = vrsqrt.f32 %v201_v44  ;;  %vm204_vm3 = vcmp.eq.f32.partialorder %v201_v44, inf  ;;  %v207_v49 = vand.u32 2147483648, %v201_v44  ;;  %vm206_vm4 = vcmp.eq.f32.partialorder %v201_v44, 0.0 }
  0xda   :  { %v134_v45 = vpop.xlane.xlu0 %133 }
  0xdb   :  { %312 = vrsqrt.f32 %v134_v45  ;;  %vm137_vm5 = vcmp.eq.f32.partialorder %v134_v45, inf  ;;  %v140_v56 = vand.u32 2147483648, %v134_v45  ;;  %vm139_vm6 = vcmp.eq.f32.partialorder %v134_v45, 0.0 }
  0xe3   :  { %v311_v46 = vpop.eup %310  ;;  %v251_v61 = vpop.xlane.xlu1 %250 }
  0xe4   :  { %v203_v48 = vmul.f32 %v311_v46, %v201_v44 }
  0xe6   :  { %v205_v50 = vsel %vm204_vm3, %v201_v44, %v203_v48 }
  0xe7   :  { %v208_v52 = vsel %vm206_vm4, %v207_v49, %v205_v50  ;;  %v268_v2 = vpop.xlane.xlu1 %267 }
  0xe8   :  { %v313_v51 = vpop.eup %312  ;;  %v209_v54 = vsub.f32 100.0, %v208_v52  ;;  %v269_v5 = vadd.f32 %v268_v2, %v251_v61 }
  0xe9   :  { %v136_v55 = vmul.f32 %v313_v51, %v134_v45 }
  0xea   :  { %v210_v57 = vand.u32 2147483647, %v209_v54  ;;  %v270_v9 = vmul.f32 0.25, %v269_v5 }
  0xeb   :  { %v138_v58 = vsel %vm137_vm5, %v134_v45, %v136_v55 }
  0xec   :  { %v141_v59 = vsel %vm139_vm6, %v140_v56, %v138_v58  ;;  %v275_v12 = vrot.slane %v270_v9, %v274_v8 }
  0xed   :  { %v211_v60 = vadd.f32 %v210_v57, %v141_v59 }
  0xef   :  { %v218_v62 = vsel %vm217_vm7, %v211_v60, 0.0 }
  0xf0   :  { %v219_v63 = vmul.f32 %v218_v62, %v218_v62 }
  0xf2   :  { %v221_v0 = vsel %vm220_vm8, %v219_v63, 0.0 }
  0xf3   :  { %v222_v1 = vrot.slane %v221_v0, 4 }
  0xf5   :  { %v223_v3 = vadd.f32 %v222_v1, %v221_v0 }
  0xf7   :  { %v224_v4 = vrot.slane %v223_v3, 2 }
  0xf9   :  { %v225_v6 = vadd.f32 %v224_v4, %v223_v3 }
  0xfb   :  { %v226_v7 = vrot.slane %v225_v6, 1 }
  0xfd   :  { %v227_v10 = vadd.f32 %v226_v7, %v225_v6 }
  0xff   :  { %v228_v11 = vmul.f32 5e-05, %v227_v10 }
 0x101   :  { %v276_v13 = vadd.f32 %v275_v12, %v228_v11 }
 0x103   :  { %277 = vst [vmem:[#allocation10] sm:$0xff] %v276_v13 }
 0x104   :  { %405 = shalt.err (!%p402_p10)
}
 0x105   :  { %287 = dma.vmem_to_hbm [thread:$0]  %s285_s11, 128, %s516_s6, [#allocation4]  }
 0x106   :  { %420 = dma.done.wait [#allocation4], 128  }
 0x107   :  { %421 = vsyncadd [#allocation4], 4294967168 }
 0x108   :  { %291 = vsyncpa [#allocation3], 1 }
 0x109   :  { %292 = vsyncpa [#allocation6], 1 }
 0x10a   :  { %293 = vsyncpa [#allocation9], 1 }
 0x10b   :  { %294 = vsyncpa [#allocation4], 1 }

</bundles_post_ra>
